<compile_context>
chip_gen: v6e
topology: v6e:2x2x1
jax: 0.10.0
libtpu: 0.0.40
codegen_flags: <defaults>
</compile_context>

<pallas_src>
import math

import jax
import jax.numpy as jnp
from jax.experimental import pallas as pl
from jax.experimental.pallas import tpu as pltpu


LANES = 128      # lane-dense last dim
TM_MAX = 2048    # max rows per tile: 2048*128*4B = 1 MiB per f32 input buffer


def _n4_sum_kernel(x_ref, o_ref, acc_ref):
    i = pl.program_id(0)

    @pl.when(i == 0)
    def _():
        acc_ref[...] = jnp.zeros_like(acc_ref)

    x = x_ref[...].astype(jnp.float32)
    x2 = x * x
    acc_ref[...] += x2 * x2          # |x|^4 == x^4 (even power), pure VPU

    @pl.when(i == pl.num_programs(0) - 1)
    def _():
        # single cross-lane/sublane reduce at the very end
        o_ref[0, 0] = jnp.sum(acc_ref[...])


def _n4_sum_all(flat: jax.Array) -> jax.Array:
    """sum(x^4) over a flat 1-D array, computed in one Pallas kernel."""
    n = flat.shape[0]
    # rows of a lane-dense (rows, 128) slab; round rows to a multiple of 32 so
    # sublane packing is full for f32/bf16/int8 alike.
    rows = max(1, math.ceil(n / LANES))
    rows = math.ceil(rows / 32) * 32
    tm = min(TM_MAX, rows)
    rows = math.ceil(rows / tm) * tm          # pad rows to a multiple of tm
    padded = rows * LANES

    # zero-pad (zeros contribute 0 to |x|^4); keep original dtype, cast in-kernel
    x = jnp.zeros((padded,), flat.dtype).at[:n].set(flat).reshape(rows, LANES)

    out = pl.pallas_call(
        _n4_sum_kernel,
        out_shape=jax.ShapeDtypeStruct((1, 1), jnp.float32),
        grid_spec=pltpu.PrefetchScalarGridSpec(
            num_scalar_prefetch=0,
            grid=(rows // tm,),
            in_specs=[pl.BlockSpec((tm, LANES), lambda i: (i, 0))],
            out_specs=pl.BlockSpec(
                (1, 1), lambda i: (0, 0), memory_space=pltpu.SMEM
            ),
            scratch_shapes=[pltpu.VMEM((tm, LANES), jnp.float32)],
        ),
        compiler_params=pltpu.CompilerParams(
            dimension_semantics=("arbitrary",)
        ),
    )(x)
    return out[0, 0]


def n4_regularizer(factors, weight: float) -> jax.Array:
    """JAX/Pallas equivalent of N4(weight).forward(factors)."""
    batch = factors[0].shape[0]
    # All factors share the same weight -> fuse into one kernel launch.
    flat = jnp.concatenate([f.reshape(-1) for f in factors])
    total = _n4_sum_all(flat)
    return jnp.float32(weight) * total / jnp.float32(batch)


def _reference(factors, weight: float) -> jax.Array:
    norm = jnp.float32(0.0)
    for f in factors:
        norm = norm + jnp.float32(weight) * jnp.sum(
            jnp.abs(f.astype(jnp.float32)) ** 4
        )
    return norm / jnp.float32(factors[0].shape[0])


if __name__ == "__main__":
    key = jax.random.PRNGKey(0)
    k1, k2, k3 = jax.random.split(key, 3)
    batch, rank = 8, 32
    weight = 0.05
    # typical tkbc usage: a tuple of embedding factors, each (batch, rank)
    factors = (
        jax.random.normal(k1, (batch, rank), dtype=jnp.float32),
        jax.random.normal(k2, (batch, rank), dtype=jnp.float32),
        jax.random.normal(k3, (batch, rank), dtype=jnp.float32),
    )

    out = n4_regularizer(factors, weight)
    out = jax.block_until_ready(out)

    ref = _reference(factors, weight)
    assert jnp.allclose(out, ref, rtol=1e-5, atol=1e-5), (out, ref)
    print("KERNEL_OK")
</pallas_src>

<mosaic_0001>
module attributes {stable_mosaic.version = 11 : i64} {
  func.func @_n4_sum_kernel(%arg0: i32, %arg1: memref<32x128xf32, #tpu.memory_space<vmem>>, %arg2: memref<1x1xf32, #tpu.memory_space<smem>>, %arg3: memref<32x128xf32, #tpu.memory_space<vmem>>) attributes {dimension_semantics = [#tpu.dimension_semantics<arbitrary>], iteration_bounds = array<i64: 1>, scalar_prefetch = 0 : i64, scratch_operands = 1 : i64, tpu.core_type = #tpu.core_type<tc>, window_params = [{transform_indices = @transform_0, window_bounds = array<i64: 32, 128>}, {transform_indices = @transform_1, window_bounds = array<i64: 1, 1>}]} {
    %c0_i32 = arith.constant 0 : i32
    %0 = arith.cmpi eq, %arg0, %c0_i32 : i32
    %1 = arith.extui %0 : i1 to i32
    %c0_i32_0 = arith.constant 0 : i32
    %2 = arith.cmpi ne, %1, %c0_i32_0 : i32
    scf.if %2 {
      %cst = arith.constant 0.000000e+00 : f32
      %12 = vector.broadcast %cst : f32 to vector<32x128xf32>
      %c0_8 = arith.constant 0 : index
      %c0_9 = arith.constant 0 : index
      %13 = vector.load %arg3[%c0_8, %c0_9] : memref<32x128xf32, #tpu.memory_space<vmem>>, vector<32x128xf32>
      tpu.vector_store %arg3[%c0_8, %c0_9], %12 {strides = array<i32>} : memref<32x128xf32, #tpu.memory_space<vmem>>, vector<32x128xf32>,
    } else {
    }
    %c0 = arith.constant 0 : index
    %c0_1 = arith.constant 0 : index
    %3 = vector.load %arg1[%c0, %c0_1] : memref<32x128xf32, #tpu.memory_space<vmem>>, vector<32x128xf32>
    %4 = arith.mulf %3, %3 : vector<32x128xf32>
    %c0_2 = arith.constant 0 : index
    %c0_3 = arith.constant 0 : index
    %5 = vector.load %arg3[%c0_2, %c0_3] : memref<32x128xf32, #tpu.memory_space<vmem>>, vector<32x128xf32>
    %6 = arith.mulf %4, %4 : vector<32x128xf32>
    %7 = arith.addf %5, %6 : vector<32x128xf32>
    %c0_4 = arith.constant 0 : index
    %c0_5 = arith.constant 0 : index
    %8 = vector.load %arg3[%c0_4, %c0_5] : memref<32x128xf32, #tpu.memory_space<vmem>>, vector<32x128xf32>
    tpu.vector_store %arg3[%c0_4, %c0_5], %7 {strides = array<i32>} : memref<32x128xf32, #tpu.memory_space<vmem>>, vector<32x128xf32>,
    %c0_i32_6 = arith.constant 0 : i32
    %9 = arith.cmpi eq, %arg0, %c0_i32_6 : i32
    %10 = arith.extui %9 : i1 to i32
    %c0_i32_7 = arith.constant 0 : i32
    %11 = arith.cmpi ne, %10, %c0_i32_7 : i32
    scf.if %11 {
      %c0_8 = arith.constant 0 : index
      %c0_9 = arith.constant 0 : index
      %12 = vector.load %arg3[%c0_8, %c0_9] : memref<32x128xf32, #tpu.memory_space<vmem>>, vector<32x128xf32>
      %13 = vector.shape_cast %12 : vector<32x128xf32> to vector<1x32x128xf32>
      %cst = arith.constant dense<0.000000e+00> : vector<1xf32>
      %14 = vector.multi_reduction <add>, %13, %cst [1, 2] : vector<1x32x128xf32> to vector<1xf32>
      %15 = vector.shape_cast %14 : vector<1xf32> to vector<1x1x1xf32>
      %16 = vector.extract %15[0, 0, 0] : f32 from vector<1x1x1xf32>
      %c0_10 = arith.constant 0 : index
      %c0_11 = arith.constant 0 : index
      %17 = memref.load %arg2[%c0_10, %c0_11] : memref<1x1xf32, #tpu.memory_space<smem>>
      memref.store %16, %arg2[%c0_10, %c0_11] : memref<1x1xf32, #tpu.memory_space<smem>>
    } else {
    }
    return
  }
  func.func @transform_0(%arg0: i32) -> (i32, i32) {
    %c0_i32 = arith.constant 0 : i32
    %c0_i32_0 = arith.constant 0 : i32
    return %arg0, %c0_i32 : i32, i32
  }
  func.func @transform_1(%arg0: i32) -> (i32, i32) {
    %c0_i32 = arith.constant 0 : i32
    %c0_i32_0 = arith.constant 0 : i32
    %c0_i32_1 = arith.constant 0 : i32
    return %c0_i32, %c0_i32_0 : i32, i32
  }
}

</mosaic_0001>

<bundles_post_ra>
// kernel: tpu_custom_call.1
= control target key start
LH: loop header
LB: loop body
LE: loop exit
PB: predicated region body
PF: predicated region fallthrough
CT: control target
= control target key end

     0   :  { %6 = vsyncpa [#allocation4], 0  ;;  %s148_s0 = inlined_call_operand.hbm [shape: f32[32,128], index: 0, kind: input, shape index: {}]   ;;  %s149_s1 = inlined_call_operand.hbm [shape: f32[1,1], index: 1, kind: output, shape index: {}]  }
   0x1   :  { %7 = vsyncpa [#allocation5], 0  ;;  %s128_s6 = smov [#allocation3]  }
   0x2   :  { %s13_s7 = sshll.u32 %s128_s6, 4  ;;  %s14_s7 = int_to_ptr.vmem [resolvable:$true] %s13_s7 }
   0x3   :  { %s104_s8 = scalar_lea.vmem %s14_s7, 512  ;;  %p109_p1 = scmp.lt.s32.totalorder %s14_s7, %s14_s7 }
   0x4   :  { %p105_p0 = scmp.ne.s32.totalorder %s14_s7, %s104_s8  ;;  %p110_p2 = scmp.lt.s32.totalorder %s104_s8, %s104_s8 }
   0x6   :  { %p111_p3 = por %p110_p2, %p109_p1 }
   0x8   :  { %p112_p4 = pnand %p111_p3, %p105_p0 }
   0xa   :  { %115 = shalt.err (!%p112_p4)
}
   0xb   :  { %s129_s9 = smov 128   ;;  %s130_s10 = smov 8  }
   0xc   :  { %19 = dma.hbm_to_vmem [thread:$0]  %s148_s0, 512, %s14_s7, [#allocation4], %s129_s9, %s129_s9, %s130_s10  }
   0xd   :  { %124 = dma.done.wait [#allocation4], 512  }
   0xe   :  { %125 = vsyncadd [#allocation4], 4294966784  ;;  %v31_v0 = vld [vmem:[#allocation3] sm:$0xff]  ;;  %v32_v1 = vld [vmem:[#allocation3 + $0x8] sm:$0xff]  ;;  %s131_s13 = smov [#allocation6]  }
   0xf   :  { %v33_v2 = vld [vmem:[#allocation3 + $0x10] sm:$0xff]  ;;  %v34_v3 = vld [vmem:[#allocation3 + $0x18] sm:$0xff]  ;;  %v35_v4 = vmul.f32 %v31_v0, %v31_v0  ;;  %v36_v5 = vmul.f32 %v32_v1, %v32_v1 }
  0x10   :  { %v37_v6 = vmul.f32 %v33_v2, %v33_v2  ;;  %v38_v7 = vmul.f32 %v34_v3, %v34_v3 }
  0x11   :  { %v43_v8 = vmul.f32 %v35_v4, %v35_v4  ;;  %v44_v9 = vmul.f32 %v36_v5, %v36_v5 }
  0x12   :  { %v45_v10 = vmul.f32 %v37_v6, %v37_v6  ;;  %v46_v11 = vmul.f32 %v38_v7, %v38_v7 }
  0x13   :  { %v62_v12 = vadd.f32 %v44_v9, %v43_v8 }
  0x15   :  { %v63_v13 = vadd.f32 %v62_v12, %v45_v10 }
  0x17   :  { %v64_v14 = vadd.f32 %v63_v13, %v46_v11 }
  0x19   :  { %65 = vadd.xlane.f32.xlu0 %v64_v14 }
  0xa2   :  { %v66_v15 = vpop.xlane.xlu0 %65 }
  0xa3   :  { %v67_v16 = vrot.slane %v66_v15, 4 }
  0xa5   :  { %v68_v17 = vadd.f32 %v67_v16, %v66_v15 }
  0xa7   :  { %v69_v18 = vrot.slane %v68_v17, 2 }
  0xa9   :  { %v70_v19 = vadd.f32 %v69_v18, %v68_v17 }
  0xab   :  { %v71_v20 = vrot.slane %v70_v19, 1 }
  0xad   :  { %v72_v21 = vadd.f32 %v71_v20, %v70_v19 }
  0xaf   :  { %90 = vpush %v72_v21 }
  0xe0   :  { %s91_s0 = spop %90 }
  0xe1   :  { %75 = sst [smem:[#allocation6]] %s91_s0 }
  0xe2   :  { %83 = dma.smem_to_hbm %s131_s13, 16, %s149_s1, [#allocation5]  }
  0xe3   :  { %126 = dma.done.wait [#allocation5], 16  }
  0xe4   :  { %127 = vsyncadd [#allocation5], 4294967280 }
  0xe5   :  { %87 = sfence }
  0xe6   :  { %88 = vsyncpa [#allocation4], 1 }
  0xe7   :  { %89 = vsyncpa [#allocation5], 1 }

</bundles_post_ra>
